<compile_context>
chip_gen: v7x
topology: tpu7x:2x2x1
jax: 0.10.0
libtpu: 0.0.40
codegen_flags: <defaults>
</compile_context>

<pallas_src>
import functools

import jax
import jax.numpy as jnp
from jax.experimental import pallas as pl
from jax.experimental.pallas import tpu as pltpu


_LANE = 128
_MAX_HW_TILE = 4096  # per-tile lane cap (keeps the unrolled VPU add chain short)


def _cdiv(a, b):
    return (a + b - 1) // b


def _round_down(a, b):
    return (a // b) * b


def _vmem_capacity_bytes():
    try:
        return int(pltpu.get_tpu_info().vmem_capacity_bytes)
    except Exception:
        return 64 << 20  # conservative default (v7x per-core VMEM)


# ------------------------------ pool (global sum) ------------------------------

def _pool_kernel(x_ref, s_ref, *, thw, hw, num_t):
    # x_ref: (bn, C, thw) tile; s_ref: (bn, C, 128) f32 lane-partial sums,
    # resident across the t (reduction) axis.
    @pl.when(pl.program_id(1) == 0)
    def _():
        s_ref[...] = jnp.zeros_like(s_ref)

    base = pl.program_id(1) * thw
    lane = jax.lax.broadcasted_iota(jnp.int32, (1, 1, _LANE), 2)
    # Valid lane count of the (possibly partial) LAST tile; chunks entirely
    # inside it never need masking (static elision below).
    rem = hw - (num_t - 1) * thw

    acc = jnp.zeros(s_ref.shape, jnp.float32)
    for s in range(thw // _LANE):
        chunk = x_ref[:, :, s * _LANE:(s + 1) * _LANE].astype(jnp.float32)
        if (s + 1) * _LANE > rem:  # static: this chunk may hold OOB lanes in the last tile
            valid = (base + s * _LANE + lane) < hw
            chunk = jnp.where(valid, chunk, 0.0)
        acc = acc + chunk          # pure VPU adds, 128-lane dense
    s_ref[...] += acc


# ------------------------- fused squeeze-excite + rescale ----------------------

def _se_weights(part, w1t, b1, w2t, b2, inv_hw):
    # part: (bn, C, 128) lane-partial sums.  Tiny compute, runs once per block.
    avg = jnp.sum(part, axis=-1) * inv_hw                                  # (bn, C)
    h = jnp.dot(avg, w1t, preferred_element_type=jnp.float32) + b1         # (bn, Cr)
    h = jnp.maximum(h, 0.0)
    z = jnp.dot(h, w2t, preferred_element_type=jnp.float32) + b2           # (bn, C)
    return jax.nn.sigmoid(z)


def _scale_kernel(x_ref, part_ref, w1t_ref, b1_ref, w2t_ref, b2_ref, o_ref, y_scr,
                  *, inv_hw):
    # SE weights computed once per batch block (t == 0), reused for every HW tile.
    @pl.when(pl.program_id(1) == 0)
    def _():
        y = _se_weights(part_ref[...], w1t_ref[...], b1_ref[...],
                        w2t_ref[...], b2_ref[...], inv_hw)
        y_scr[...] = y[:, :, None]

    # Multiply in the input dtype (no full-tile f32 upcast held live).
    o_ref[...] = x_ref[...] * y_scr[...].astype(o_ref.dtype)


# ----------------------------- single-pass fast path ---------------------------

def _fused_kernel(x_ref, w1t_ref, b1_ref, w2t_ref, b2_ref, o_ref, *, inv_hw):
    xs = jnp.sum(x_ref[...].astype(jnp.float32), axis=-1)                  # (bn, C)
    h = jnp.dot(xs * inv_hw, w1t_ref[...],
                preferred_element_type=jnp.float32) + b1_ref[...]
    h = jnp.maximum(h, 0.0)
    z = jnp.dot(h, w2t_ref[...],
                preferred_element_type=jnp.float32) + b2_ref[...]
    y = jax.nn.sigmoid(z)
    o_ref[...] = x_ref[...] * y[:, :, None].astype(o_ref.dtype)


# ------------------------------------ wrapper ----------------------------------

@functools.partial(jax.jit, static_argnames=("force_tiled",))
def ca_layer(x, w1, b1, w2, b2, *, force_tiled=False):
    """CALayer forward.  x: (N, C, H, W); w1: (Cr, C); b1: (Cr,); w2: (C, Cr); b2: (C,)."""
    N, C, H, W = x.shape
    Cr = w1.shape[0]
    HW = H * W
    itemsize = jnp.dtype(x.dtype).itemsize
    inv_hw = float(1.0 / HW)

    x2 = x.reshape(N, C, HW)
    w1t = jnp.transpose(w1).astype(jnp.float32)   # (C, Cr)
    w2t = jnp.transpose(w2).astype(jnp.float32)   # (Cr, C)
    b1r = b1.reshape(1, Cr).astype(jnp.float32)
    b2r = b2.reshape(1, C).astype(jnp.float32)

    # Generation-aware budgets (v7x: 64 MiB VMEM; v5e/v6e: 128 MiB).
    vmem_cap = _vmem_capacity_bytes()
    vmem_limit = min((vmem_cap * 3) // 4, 100 << 20)
    target_block = max(4 << 20, min(8 << 20, vmem_cap // 10))

    def _cparams(sem):
        return pltpu.CompilerParams(dimension_semantics=sem,
                                    vmem_limit_bytes=vmem_limit)

    per_img_bytes = C * HW * itemsize
    fast_budget = vmem_limit // 5  # in+out double-buffered ~= 4x block + slack

    # ---------------- fast path: one (bn, C, HW) block resident in VMEM ---------------
    if (per_img_bytes <= fast_budget and not force_tiled) or HW <= _LANE:
        bn = max(1, min(N, max(1, fast_budget // max(1, per_img_bytes))))
        if N >= 2:
            bn = min(bn, _cdiv(N, 2))     # >= 2 "parallel" steps for v7x megacore
        grid_b = _cdiv(N, bn)
        out = pl.pallas_call(
            functools.partial(_fused_kernel, inv_hw=inv_hw),
            out_shape=jax.ShapeDtypeStruct((N, C, HW), x.dtype),
            grid_spec=pltpu.PrefetchScalarGridSpec(
                num_scalar_prefetch=0,
                grid=(grid_b,),
                in_specs=[
                    pl.BlockSpec((bn, C, HW), lambda b: (b, 0, 0)),
                    pl.BlockSpec((C, Cr), lambda b: (0, 0)),
                    pl.BlockSpec((1, Cr), lambda b: (0, 0)),
                    pl.BlockSpec((Cr, C), lambda b: (0, 0)),
                    pl.BlockSpec((1, C), lambda b: (0, 0)),
                ],
                out_specs=pl.BlockSpec((bn, C, HW), lambda b: (b, 0, 0)),
            ),
            compiler_params=_cparams(("parallel",)),
            cost_estimate=pl.CostEstimate(
                flops=2 * N * C * HW + 4 * N * C * Cr,
                transcendentals=N * C,
                bytes_accessed=2 * N * C * HW * itemsize),
        )(x2, w1t, b1r, w2t, b2r)
        return out.reshape(N, C, H, W)

    # ---------------- tiled path: pool reduction + fused SE / rescale -----------------
    # thw: multiple of 128, sized so one (bn, C, thw) block is ~target_block bytes.
    thw_budget = max(_LANE, _round_down(target_block // max(1, C * itemsize), _LANE))
    thw = min(_round_down(HW, _LANE), _MAX_HW_TILE, thw_budget)
    num_t = _cdiv(HW, thw)
    # TODO(synk): for pathological channel counts (C*128*itemsize alone exceeding the
    # VMEM budget) the channel axis would also need tiling with a separate SE pass.

    per_img_block_bytes = C * thw * itemsize
    bn = max(1, min(N, max(1, target_block // per_img_block_bytes)))
    if N >= 2:
        bn = min(bn, _cdiv(N, 2))         # keep >= 2 parallel batch steps (v7x megacore)
    grid_b = _cdiv(N, bn)

    # phase 1: lane-partial global sums, (N, C, 128) f32.
    partials = pl.pallas_call(
        functools.partial(_pool_kernel, thw=thw, hw=HW, num_t=num_t),
        out_shape=jax.ShapeDtypeStruct((N, C, _LANE), jnp.float32),
        grid_spec=pltpu.PrefetchScalarGridSpec(
            num_scalar_prefetch=0,
            grid=(grid_b, num_t),
            in_specs=[pl.BlockSpec((bn, C, thw), lambda b, t: (b, 0, t))],
            out_specs=pl.BlockSpec((bn, C, _LANE), lambda b, t: (b, 0, 0)),
        ),
        compiler_params=_cparams(("parallel", "arbitrary")),
        cost_estimate=pl.CostEstimate(
            flops=N * C * HW,
            transcendentals=0,
            bytes_accessed=N * C * HW * itemsize + N * C * _LANE * 4),
    )(x2)

    # phase 2: fused squeeze-excite (once per batch block) + broadcasted rescale.
    out = pl.pallas_call(
        functools.partial(_scale_kernel, inv_hw=inv_hw),
        out_shape=jax.ShapeDtypeStruct((N, C, HW), x.dtype),
        grid_spec=pltpu.PrefetchScalarGridSpec(
            num_scalar_prefetch=0,
            grid=(grid_b, num_t),
            in_specs=[
                pl.BlockSpec((bn, C, thw), lambda b, t: (b, 0, t)),
                pl.BlockSpec((bn, C, _LANE), lambda b, t: (b, 0, 0)),
                pl.BlockSpec((C, Cr), lambda b, t: (0, 0)),
                pl.BlockSpec((1, Cr), lambda b, t: (0, 0)),
                pl.BlockSpec((Cr, C), lambda b, t: (0, 0)),
                pl.BlockSpec((1, C), lambda b, t: (0, 0)),
            ],
            out_specs=pl.BlockSpec((bn, C, thw), lambda b, t: (b, 0, t)),
            scratch_shapes=[pltpu.VMEM((bn, C, 1), jnp.float32)],
        ),
        compiler_params=_cparams(("parallel", "arbitrary")),
        cost_estimate=pl.CostEstimate(
            flops=N * C * HW + 4 * N * C * Cr,
            transcendentals=N * C,
            bytes_accessed=2 * N * C * HW * itemsize + N * C * _LANE * 4),
    )(x2, partials, w1t, b1r, w2t, b2r)

    return out.reshape(N, C, H, W)


def ca_layer_ref(x, w1, b1, w2, b2):
    """Plain-JAX reference matching the PyTorch forward."""
    y = jnp.mean(x, axis=(2, 3), keepdims=True)                  # (N, C, 1, 1)
    y = jnp.einsum("rc,nchw->nrhw", w1, y) + b1[None, :, None, None]
    y = jnp.maximum(y, 0.0)
    y = jnp.einsum("cr,nrhw->nchw", w2, y) + b2[None, :, None, None]
    y = jax.nn.sigmoid(y)
    return x * y


def _make_inputs(key, N, C, H, W, reduction):
    Cr = max(1, C // reduction)
    kx, k1, k2, k3, k4 = jax.random.split(key, 5)
    x = jax.random.normal(kx, (N, C, H, W), dtype=jnp.float32)
    # Conv2d(C, C//r, 1): weight (Cr, C, 1, 1) -> (Cr, C); bias (Cr,)
    w1 = jax.random.normal(k1, (Cr, C), dtype=jnp.float32) * 0.1
    b1 = jax.random.normal(k2, (Cr,), dtype=jnp.float32) * 0.1
    # Conv2d(C//r, C, 1): weight (C, Cr, 1, 1) -> (C, Cr); bias (C,)
    w2 = jax.random.normal(k3, (C, Cr), dtype=jnp.float32) * 0.1
    b2 = jax.random.normal(k4, (C,), dtype=jnp.float32) * 0.1
    return x, w1, b1, w2, b2


if __name__ == "__main__":
    key = jax.random.PRNGKey(0)
    k_a, k_b = jax.random.split(key, 2)

    # Case A: small canonical shape -> exercises the single-kernel fast path,
    #         and (with force_tiled=True) the pool + fused-rescale path.
    xa, w1a, b1a, w2a, b2a = _make_inputs(k_a, N=2, C=16, H=16, W=16, reduction=8)
    out_fast = jax.block_until_ready(ca_layer(xa, w1a, b1a, w2a, b2a))
    out_tile = jax.block_until_ready(ca_layer(xa, w1a, b1a, w2a, b2a, force_tiled=True))
    ref_a = jax.block_until_ready(ca_layer_ref(xa, w1a, b1a, w2a, b2a))
    assert out_fast.shape == xa.shape and out_fast.dtype == xa.dtype
    assert jnp.allclose(out_fast, ref_a, atol=1e-5, rtol=1e-5), "fast path mismatch"
    assert jnp.allclose(out_tile, ref_a, atol=1e-5, rtol=1e-5), "tiled path mismatch"

    # Case B: ragged spatial size (13*13 = 169) and non-divisible batch (N=3, bn=2)
    #         -> exercises partial HW tiles (lane masking) and partial batch blocks.
    xb, w1b, b1b, w2b, b2b = _make_inputs(k_b, N=3, C=8, H=13, W=13, reduction=4)
    out_b = jax.block_until_ready(ca_layer(xb, w1b, b1b, w2b, b2b, force_tiled=True))
    ref_b = jax.block_until_ready(ca_layer_ref(xb, w1b, b1b, w2b, b2b))
    assert out_b.shape == xb.shape and out_b.dtype == xb.dtype
    assert jnp.allclose(out_b, ref_b, atol=1e-5, rtol=1e-5), "ragged tiled mismatch"

    print("KERNEL_OK")
</pallas_src>

<mosaic_0001>
module attributes {stable_mosaic.version = 11 : i64} {
  func.func @_fused_kernel(%arg0: i32, %arg1: memref<1x16x256xf32, #tpu.memory_space<vmem>>, %arg2: memref<16x2xf32, #tpu.memory_space<vmem>>, %arg3: memref<1x2xf32, #tpu.memory_space<vmem>>, %arg4: memref<2x16xf32, #tpu.memory_space<vmem>>, %arg5: memref<1x16xf32, #tpu.memory_space<vmem>>, %arg6: memref<1x16x256xf32, #tpu.memory_space<vmem>>) attributes {dimension_semantics = [#tpu.dimension_semantics<parallel>], iteration_bounds = array<i64: 2>, scalar_prefetch = 0 : i64, scratch_operands = 0 : i64, tpu.core_type = #tpu.core_type<tc>, window_params = [{transform_indices = @transform_0, window_bounds = array<i64: 1, 16, 256>}, {pipeline_mode = #tpu.pipeline_mode<synchronous>, transform_indices = @transform_1, window_bounds = array<i64: 16, 2>}, {pipeline_mode = #tpu.pipeline_mode<synchronous>, transform_indices = @transform_2, window_bounds = array<i64: 1, 2>}, {pipeline_mode = #tpu.pipeline_mode<synchronous>, transform_indices = @transform_3, window_bounds = array<i64: 2, 16>}, {pipeline_mode = #tpu.pipeline_mode<synchronous>, transform_indices = @transform_4, window_bounds = array<i64: 1, 16>}, {transform_indices = @transform_5, window_bounds = array<i64: 1, 16, 256>}]} {
    %c0 = arith.constant 0 : index
    %c0_0 = arith.constant 0 : index
    %c0_1 = arith.constant 0 : index
    %0 = vector.load %arg1[%c0, %c0_0, %c0_1] : memref<1x16x256xf32, #tpu.memory_space<vmem>>, vector<1x16x256xf32>
    %cst = arith.constant dense<0.000000e+00> : vector<1x16xf32>
    %1 = vector.multi_reduction <add>, %0, %cst [2] : vector<1x16x256xf32> to vector<1x16xf32>
    %cst_2 = arith.constant 3.906250e-03 : f32
    %2 = vector.broadcast %cst_2 : f32 to vector<1x16xf32>
    %3 = arith.mulf %1, %2 : vector<1x16xf32>
    %c0_3 = arith.constant 0 : index
    %c0_4 = arith.constant 0 : index
    %4 = vector.load %arg2[%c0_3, %c0_4] : memref<16x2xf32, #tpu.memory_space<vmem>>, vector<16x2xf32>
    %cst_5 = arith.constant dense<0.000000e+00> : vector<1x2xf32>
    %5 = tpu.matmul %3, %4, %cst_5 {dimension_numbers = #tpu.dot_dimension_numbers<[1], [0], [0], [1], [0, 0, 1, 1], [], []>} : vector<1x16xf32>, vector<16x2xf32>, vector<1x2xf32> -> vector<1x2xf32>
    %c0_6 = arith.constant 0 : index
    %c0_7 = arith.constant 0 : index
    %6 = vector.load %arg3[%c0_6, %c0_7] : memref<1x2xf32, #tpu.memory_space<vmem>>, vector<1x2xf32>
    %7 = arith.addf %5, %6 : vector<1x2xf32>
    %cst_8 = arith.constant 0.000000e+00 : f32
    %8 = vector.broadcast %cst_8 : f32 to vector<1x2xf32>
    %9 = arith.maximumf %7, %8 : vector<1x2xf32>
    %c0_9 = arith.constant 0 : index
    %c0_10 = arith.constant 0 : index
    %10 = vector.load %arg4[%c0_9, %c0_10] : memref<2x16xf32, #tpu.memory_space<vmem>>, vector<2x16xf32>
    %cst_11 = arith.constant dense<0.000000e+00> : vector<1x16xf32>
    %11 = tpu.matmul %9, %10, %cst_11 {dimension_numbers = #tpu.dot_dimension_numbers<[1], [0], [0], [1], [0, 0, 1, 1], [], []>} : vector<1x2xf32>, vector<2x16xf32>, vector<1x16xf32> -> vector<1x16xf32>
    %c0_12 = arith.constant 0 : index
    %c0_13 = arith.constant 0 : index
    %12 = vector.load %arg5[%c0_12, %c0_13] : memref<1x16xf32, #tpu.memory_space<vmem>>, vector<1x16xf32>
    %13 = arith.addf %11, %12 : vector<1x16xf32>
    %14 = arith.negf %13 : vector<1x16xf32>
    %15 = math.exp %14 : vector<1x16xf32>
    %cst_14 = arith.constant 1.000000e+00 : f32
    %16 = vector.broadcast %cst_14 : f32 to vector<1x16xf32>
    %17 = arith.addf %16, %15 : vector<1x16xf32>
    %18 = arith.divf %16, %17 : vector<1x16xf32>
    %c0_15 = arith.constant 0 : index
    %c0_16 = arith.constant 0 : index
    %c0_17 = arith.constant 0 : index
    %19 = vector.load %arg1[%c0_15, %c0_16, %c0_17] : memref<1x16x256xf32, #tpu.memory_space<vmem>>, vector<1x16x256xf32>
    %20 = vector.shape_cast %18 : vector<1x16xf32> to vector<1x16x1xf32>
    %21 = vector.broadcast %20 : vector<1x16x1xf32> to vector<1x16x256xf32>
    %22 = arith.mulf %19, %21 : vector<1x16x256xf32>
    %c0_18 = arith.constant 0 : index
    %c0_19 = arith.constant 0 : index
    %c0_20 = arith.constant 0 : index
    %23 = vector.load %arg6[%c0_18, %c0_19, %c0_20] : memref<1x16x256xf32, #tpu.memory_space<vmem>>, vector<1x16x256xf32>
    tpu.vector_store %arg6[%c0_18, %c0_19, %c0_20], %22 {strides = array<i32>} : memref<1x16x256xf32, #tpu.memory_space<vmem>>, vector<1x16x256xf32>,
    return
  }
  func.func @transform_0(%arg0: i32) -> (i32, i32, i32) {
    %c0_i32 = arith.constant 0 : i32
    %c0_i32_0 = arith.constant 0 : i32
    %c0_i32_1 = arith.constant 0 : i32
    return %arg0, %c0_i32, %c0_i32_0 : i32, i32, i32
  }
  func.func @transform_1(%arg0: i32) -> (i32, i32) {
    %c0_i32 = arith.constant 0 : i32
    %c0_i32_0 = arith.constant 0 : i32
    %c0_i32_1 = arith.constant 0 : i32
    return %c0_i32, %c0_i32_0 : i32, i32
  }
  func.func @transform_2(%arg0: i32) -> (i32, i32) {
    %c0_i32 = arith.constant 0 : i32
    %c0_i32_0 = arith.constant 0 : i32
    %c0_i32_1 = arith.constant 0 : i32
    return %c0_i32, %c0_i32_0 : i32, i32
  }
  func.func @transform_3(%arg0: i32) -> (i32, i32) {
    %c0_i32 = arith.constant 0 : i32
    %c0_i32_0 = arith.constant 0 : i32
    %c0_i32_1 = arith.constant 0 : i32
    return %c0_i32, %c0_i32_0 : i32, i32
  }
  func.func @transform_4(%arg0: i32) -> (i32, i32) {
    %c0_i32 = arith.constant 0 : i32
    %c0_i32_0 = arith.constant 0 : i32
    %c0_i32_1 = arith.constant 0 : i32
    return %c0_i32, %c0_i32_0 : i32, i32
  }
  func.func @transform_5(%arg0: i32) -> (i32, i32, i32) {
    %c0_i32 = arith.constant 0 : i32
    %c0_i32_0 = arith.constant 0 : i32
    %c0_i32_1 = arith.constant 0 : i32
    return %arg0, %c0_i32, %c0_i32_0 : i32, i32, i32
  }
}

</mosaic_0001>

<bundles_post_ra>
// kernel: ca_layer.1
= control target key start
LH: loop header
LB: loop body
LE: loop exit
PB: predicated region body
PF: predicated region fallthrough
CT: control target
= control target key end

     0   :  { %s582_s18 = smov 0   ;;  %s629_s0 = inlined_call_operand.vmem [shape: f32[2,16,256], index: 0, kind: input, shape index: {}]   ;;  %s630_s1 = inlined_call_operand.vmem [shape: f32[16,2], index: 1, kind: input, shape index: {}]   ;;  %s631_s2 = inlined_call_operand.vmem [shape: f32[1,2], index: 2, kind: input, shape index: {}]   ;;  %s632_s3 = inlined_call_operand.vmem [shape: f32[2,16], index: 3, kind: input, shape index: {}]   ;;  %s633_s4 = inlined_call_operand.vmem [shape: f32[1,16], index: 4, kind: input, shape index: {}]   ;;  %s634_s5 = inlined_call_operand.vmem [shape: f32[2,16,256], index: 5, kind: output, shape index: {}]  }
   0x1 LB: > { %s489_s19 = sadd.s32 4294967295, %s547_s18   ;;  %p493_p0 = scmp.ge.s32.totalorder %s547_s18, 1  ;;  %s547_s18 = sphi %s582_s18, %s15_s18  }
   0x2   : > { %p187_p1 = scmp.lt.s32.totalorder %s547_s18, 3 }
   0x4   : > { %p188_p2 = pnand %p493_p0, %p187_p1 }
   0x5   : > { %p215_p3 = scmp.lt.s32.totalorder (!%p188_p2), %s489_s19, 1  ;;  %v237_v6 = vld [vmem:[%s630_s1] sm:$0xff] (!%p188_p2)  ;;  %v238_v7 = vld [vmem:[%s630_s1 + $0x8] sm:$0xff] (!%p188_p2)  ;;  %v549_v9 = vmov (!%p188_p2), 0.0|0.0   ;;  %vm550_vm0 = vmmov (!%p188_p2), 0   ;;  %v551_v10 = vmov (!%p188_p2), 0.0   ;;  %v242_v11 = vlaneseq (!%p188_p2) }
   0x6   : > { %191 = sbr.rel (%p188_p2) target bundleno = 750 (0x2ee), region = 40  ;;  %v524_v8 = vpack.c.bf16 (!%p188_p2), %v238_v7, %v237_v6  ;;  %523 = vmatprep.subr.bf16.mxu0 (!%p188_p2), %v549_v9  ;;  %515 = vmatprep.mubr.msk.f32.mxu0 (!%p188_p2), %vm550_vm0, %v551_v10  ;;  %vm253_vm1 = vcmask (!%p188_p2), 130112   ;;  %vm255_vm2 = vcmask (!%p188_p2), 130048   ;;  %v329_v24 = vld [vmem:[%s632_s3] sm:$0x3] (!%p188_p2)  ;;  %vm335_vm3 = vcmask (!%p188_p2), 1041408  }
   0x7   : > { %518 = vmatprep.subr.mxu1 (!%p188_p2), %v551_v10  ;;  %520 = vmatprep.mubr.msk.f32.mxu1 (!%p188_p2), %vm550_vm0, %v551_v10  ;;  %v243_v12 = vand.u32 (!%p188_p2), 127, %v242_v11  ;;  %v245_v13 = vshrl.u32 (!%p188_p2), %v242_v11, 7  ;;  %v239_v25 = vld [vmem:[%s631_s2] sm:$0x1] (!%p188_p2)  ;;  %vm331_vm4 = vcmask (!%p188_p2), 15360  }
   0x8   : > { %525 = vmatpush3.bf16.msra.mxu0 (!%p188_p2), %v524_v8  ;;  %519 = vmatpush3.msk.msra.mxu1 (!%p188_p2), %vm335_vm3, %v329_v24  ;;  %v330_v30 = vld [vmem:[%s633_s4] sm:$0x1] (!%p188_p2) }
   0x9   : > { %v248_v14 = vadd.s32 (!%p188_p2), 4294967288, %v243_v12  ;;  %v246_v16 = vsub.s32 (!%p188_p2), %v243_v12, %v245_v13  ;;  %v417_v37 = vsub.s32 (!%p188_p2), 0, %v245_v13 }
   0xb   : > { %v251_v18 = vsub.s32 (!%p188_p2), %v248_v14, %v245_v13 }
   0xd   : > { %s636_s19 = smov (!%p215_p3, %s489_s19), 1 }
   0xe   : > { %s504_s20 = sshll.u32 %s636_s19, 5 }
   0xf   : > { %s219_s23 = scalar_lea.vmem %s629_s0, %s504_s20  ;;  %s224_s11 = scalar_lea.vmem %s634_s5, %s504_s20 }
  0x10   : > { %v225_v0 = vld [vmem:[%s219_s23] sm:$0xff]  ;;  %v226_v1 = vld [vmem:[%s219_s23 + $0x8] sm:$0xff]  ;;  %v598_v2 = vld [vmem:[%s219_s23 + $0x10] sm:$0xff] }
  0x11   : > { %v229_v3 = vadd.f32 %v226_v1, %v225_v0  ;;  %v600_v4 = vld [vmem:[%s219_s23 + $0x18] sm:$0xff] }
  0x12   : > { %v232_v5 = vadd.f32 %v600_v4, %v598_v2 }
  0x13   : > { %230 = vadd.xlane.f32.xlu0 %v229_v3 }
  0x17   : > { %233 = vadd.xlane.f32.xlu0 %v232_v5 }
  0xa0   : > { %v231_v15 = vpop.xlane.xlu0 %230 }
  0xa1   : > { %v235_v17 = vmul.f32 0.00390625, %v231_v15 }
  0xa3   : > { %v247_v21 = vrot.slane %v235_v17, %v246_v16 }
  0xa4   : > { %v234_v19 = vpop.xlane.xlu0 %233 }
  0xa5   : > { %v236_v20 = vmul.f32 0.00390625, %v234_v19 }
  0xa7   : > { %v252_v22 = vrot.slane %v236_v20, %v251_v18 }
  0xa9   : > { %v254_v23 = vsel %vm253_vm1, %v252_v22, %v247_v21 }
  0xaa   : > { %516 = vmatmul.mubr.msk.f32.vlgmr.msra.gmra.mrb[0].mxu0 %vm255_vm2, %v254_v23 }
 0x17d   : > { %v324_v26 = vpop.f32.mrb[0].mxu0 }
 0x17e   : > { %v325_v27 = vadd.f32 %v324_v26, %v239_v25  ;;  %v517_v28 = vpop.f32.mrb[1].mxu0 }
 0x180   : > { %v328_v29 = vmax.f32 %v325_v27, 0.0 }
 0x182   : > { %521 = vmatmul.mubr.msk.f32.vlgmr.msra.gmra.mrb[0].mxu1 %vm331_vm4, %v328_v29 }
 0x255   : > { %v405_v31 = vpop.f32.mrb[0].mxu1 }
 0x256   : > { %v406_v32 = vadd.f32 %v405_v31, %v330_v30  ;;  %v522_v33 = vpop.f32.mrb[1].mxu1 }
 0x258   : > { %v501_v34 = vmul.f32 -1.442695, %v406_v32 }
 0x25a   : > { %537 = vpow2.f32 %v501_v34 }
 0x264   : > { %v538_v35 = vpop.eup %537 }
 0x265   : > { %v412_v36 = vadd.f32 1.0, %v538_v35 }
 0x267   : > { %539 = vrcp.f32 %v412_v36 }
 0x271   : > { %v540_v38 = vpop.eup %539 }
 0x272   : > { %v418_v39 = vrot.slane %v540_v38, %v417_v37 }
 0x274   : > { %420 = vbcast.lane.b32.xlu1 %v418_v39, 256 }
 0x278   : > { %424 = vbcast.lane.b32.xlu1 %v418_v39, 264 }
 0x2e6   : > { %v421_v40 = vpop.permute.xlu1 %420 }
 0x2e7   : > { %v426_v41 = vmul.f32 %v421_v40, %v225_v0  ;;  %v427_v42 = vmul.f32 %v421_v40, %v226_v1 }
 0x2e9   : > { %430 = vst [vmem:[%s224_s11] sm:$0xff] %v426_v41  ;;  %431 = vst [vmem:[%s224_s11 + $0x8] sm:$0xff] %v427_v42 }
 0x2ea   : > { %v425_v43 = vpop.permute.xlu1 %424 }
 0x2eb   : > { %v428_v44 = vmul.f32 %v425_v43, %v598_v2  ;;  %v429_v45 = vmul.f32 %v425_v43, %v600_v4 }
 0x2ed   : > { %432 = vst [vmem:[%s224_s11 + $0x10] sm:$0xff] %v428_v44  ;;  %433 = vst [vmem:[%s224_s11 + $0x18] sm:$0xff] %v429_v45 }
 0x2ee PF: > { %s15_s18 = sadd.s32 1, %s547_s18  }
 0x2ef   : > { %p12_p4 = scmp.ge.s32.totalorder %s15_s18, 4  }
 0x2f1   :  { %14 = sbr.rel (!%p12_p4) target bundleno = 1 (0x1), region = 70 }

</bundles_post_ra>
